<compile_context>
chip_gen: v6e
topology: v6e:2x2x1
jax: 0.10.0
libtpu: 0.0.40
codegen_flags: <defaults>
</compile_context>

<pallas_src>
import functools
import math

import jax
import jax.numpy as jnp
from jax.experimental import pallas as pl
from jax.experimental.pallas import tpu as pltpu

_INV_SQRT2 = 1.0 / math.sqrt(2.0)


def _round_up(v, m):
    return (v + m - 1) // m * m


def _inv_bottleneck_kernel(x_ref, w1_ref, w2_ref, g1_ref, b1_ref, g2_ref,
                           b2_ref, mask_ref, o_ref, act_ref,
                           *, K, pad, NLv, inv_count, eps):
    # mask: 1.0 at the N*L lanes holding real conv outputs, 0.0 at the
    # per-sample padding / cross-sample junk / lane-padding columns.
    mask = mask_ref[...]                                           # (1, NLv)

    # ---------------- conv1: im2col -> single MXU matmul --------------------
    # x_ref is the packed input stored with a `pad`-lane zero head, so tap k is
    # just the static slice [k : k+NLv]; stacking taps along sublanes folds the
    # kernel width into the contraction axis.
    a1 = jnp.concatenate([x_ref[:, k:k + NLv] for k in range(K)], axis=0)
    h1 = jnp.dot(w1_ref[...], a1, preferred_element_type=jnp.float32)  # (Cm8, NLv)
    h1 = h1 * mask

    # ---------------- BN1 (training-mode batch stats, biased var) -----------
    # single fused pass: sum and sum-of-squares from the same vregs.
    s1 = jnp.sum(h1, axis=1, keepdims=True)
    q1 = jnp.sum(h1 * h1, axis=1, keepdims=True)
    mean1 = s1 * inv_count
    var1 = q1 * inv_count - mean1 * mean1
    hn1 = (h1 - mean1) * jax.lax.rsqrt(var1 + eps) * g1_ref[...] + b1_ref[...]

    # ---------------- GELU (exact erf form, torch.nn.GELU default) ----------
    act = 0.5 * hn1 * (1.0 + jax.lax.erf(hn1 * _INV_SQRT2))
    # re-mask: masked lanes become the zero padding conv2 expects.
    act = act * mask

    # ---------------- stage conv2 input (interior store, borders only) ------
    if pad > 0:
        zeros_edge = jnp.zeros((act_ref.shape[0], pad), jnp.float32)
        act_ref[:, 0:pad] = zeros_edge
        act_ref[:, NLv + pad:] = zeros_edge
    act_ref[:, pad:pad + NLv] = act

    # ---------------- conv2: im2col -> single MXU matmul --------------------
    a2 = jnp.concatenate([act_ref[:, k:k + NLv] for k in range(K)], axis=0)
    h2 = jnp.dot(w2_ref[...], a2, preferred_element_type=jnp.float32)  # (C8, NLv)
    h2 = h2 * mask

    # ---------------- BN2 ----------------------------------------------------
    s2 = jnp.sum(h2, axis=1, keepdims=True)
    q2 = jnp.sum(h2 * h2, axis=1, keepdims=True)
    mean2 = s2 * inv_count
    var2 = q2 * inv_count - mean2 * mean2
    o_ref[...] = ((h2 - mean2) * jax.lax.rsqrt(var2 + eps) * g2_ref[...]
                  + b2_ref[...]).astype(o_ref.dtype)


def inv_bottleneck_block1d(x, w1, w2, gamma1, beta1, gamma2, beta2, eps=1e-5):
    """x: (N, C, L) f32; w1: (C*mult, C, K); w2: (C, C*mult, K)."""
    N, C, L = x.shape
    Cm, C_in, K = w1.shape
    assert C_in == C and w2.shape == (C, Cm, K)
    assert K % 2 == 1, "odd kernel size expected (padding=K//2 preserves length)"
    pad = K // 2
    Lp = L + 2 * pad                     # per-sample padded segment length
    NL = N * Lp                          # packed sequence length
    NLv = _round_up(NL, 128)             # lane-dense output width
    Win = NLv + 2 * pad                  # shifted-input buffer width
    C8 = _round_up(C, 8)                 # sublane-aligned channel counts
    Cm8 = _round_up(Cm, 8)
    f32 = jnp.float32

    # ---- wrapper glue (plain JAX layout plumbing) ---------------------------
    # packed input with a `pad`-lane zero head: x_buf[c, pad + n*Lp + j] = x_pad[n, c, j]
    x_pad = jnp.pad(x.astype(f32), ((0, 0), (0, C8 - C), (pad, pad)))  # (N, C8, Lp)
    x_packed = jnp.transpose(x_pad, (1, 0, 2)).reshape(C8, NL)
    x_buf = jnp.zeros((C8, Win), f32).at[:, pad:pad + NL].set(x_packed)

    # weights flattened so rows match the im2col ordering (tap-major, channel-minor)
    w1_p = jnp.pad(w1.astype(f32), ((0, Cm8 - Cm), (0, C8 - C), (0, 0)))
    w1_flat = jnp.transpose(w1_p, (0, 2, 1)).reshape(Cm8, K * C8)
    w2_p = jnp.pad(w2.astype(f32), ((0, C8 - C), (0, Cm8 - Cm), (0, 0)))
    w2_flat = jnp.transpose(w2_p, (0, 2, 1)).reshape(C8, K * Cm8)

    g1 = jnp.pad(gamma1.astype(f32), (0, Cm8 - Cm), constant_values=1.0).reshape(Cm8, 1)
    b1 = jnp.pad(beta1.astype(f32), (0, Cm8 - Cm)).reshape(Cm8, 1)
    g2 = jnp.pad(gamma2.astype(f32), (0, C8 - C), constant_values=1.0).reshape(C8, 1)
    b2 = jnp.pad(beta2.astype(f32), (0, C8 - C)).reshape(C8, 1)

    # validity mask over the lane axis (real conv-output columns only)
    p = jnp.arange(NLv)
    j = p % Lp
    mask = ((p < NL) & (j >= pad) & (j < pad + L)).astype(f32)[None, :]

    kernel = functools.partial(_inv_bottleneck_kernel, K=K, pad=pad, NLv=NLv,
                               inv_count=1.0 / float(N * L), eps=float(eps))
    vmem = pl.BlockSpec(memory_space=pltpu.MemorySpace.VMEM)
    y_packed = pl.pallas_call(
        kernel,
        out_shape=jax.ShapeDtypeStruct((C8, NLv), f32),
        in_specs=[vmem] * 8,
        out_specs=vmem,
        scratch_shapes=[pltpu.VMEM((Cm8, Win), f32)],   # shifted conv2 input
        compiler_params=pltpu.CompilerParams(vmem_limit_bytes=32 * 1024 * 1024),
    )(x_buf, w1_flat, w2_flat, g1, b1, g2, b2, mask)

    # unpack lane-dense result back to (N, C, L)
    y = y_packed[:C, :NL].reshape(C, N, Lp)
    return jnp.transpose(y, (1, 0, 2))[:, :, pad:pad + L]


def _ref_forward(x, w1, w2, g1, b1, g2, b2, eps=1e-5):
    """Pure-JAX reference matching the PyTorch forward (training-mode BN)."""
    pad = w1.shape[-1] // 2
    dn = ('NCH', 'OIH', 'NCH')

    def bn(z, g, b):
        m = jnp.mean(z, axis=(0, 2), keepdims=True)
        v = jnp.mean((z - m) ** 2, axis=(0, 2), keepdims=True)
        return (z - m) * jax.lax.rsqrt(v + eps) * g.reshape(1, -1, 1) + b.reshape(1, -1, 1)

    h = jax.lax.conv_general_dilated(x, w1, (1,), ((pad, pad),), dimension_numbers=dn)
    h = bn(h, g1, b1)
    h = jax.nn.gelu(h, approximate=False)
    h = jax.lax.conv_general_dilated(h, w2, (1,), ((pad, pad),), dimension_numbers=dn)
    return bn(h, g2, b2)


if __name__ == "__main__":
    # Small shapes consistent with the module: channels=4, mult=4, kernel=3.
    N, C, L = 2, 4, 16
    mult, K = 4, 3
    Cm = C * mult

    key = jax.random.PRNGKey(0)
    k1, k2, k3, k4, k5, k6, kx = jax.random.split(key, 7)
    w1 = jax.random.normal(k1, (Cm, C, K), jnp.float32) * (1.0 / math.sqrt(C * K))
    w2 = jax.random.normal(k2, (C, Cm, K), jnp.float32) * (1.0 / math.sqrt(Cm * K))
    gamma1 = 1.0 + 0.1 * jax.random.normal(k3, (Cm,), jnp.float32)
    beta1 = 0.1 * jax.random.normal(k4, (Cm,), jnp.float32)
    gamma2 = 1.0 + 0.1 * jax.random.normal(k5, (C,), jnp.float32)
    beta2 = 0.1 * jax.random.normal(k6, (C,), jnp.float32)
    x = jax.random.normal(kx, (N, C, L), jnp.float32)

    out = inv_bottleneck_block1d(x, w1, w2, gamma1, beta1, gamma2, beta2)
    out = jax.block_until_ready(out)

    ref = _ref_forward(x, w1, w2, gamma1, beta1, gamma2, beta2)
    assert out.shape == (N, C, L), out.shape
    assert jnp.allclose(out, ref, atol=1e-3, rtol=1e-3), "mismatch vs pure-JAX reference"

    print("KERNEL_OK")
</pallas_src>

<mosaic_0001>
module attributes {stable_mosaic.version = 11 : i64} {
  func.func @_inv_bottleneck_kernel(%arg0: memref<8x130xf32, #tpu.memory_space<vmem>>, %arg1: memref<16x24xf32, #tpu.memory_space<vmem>>, %arg2: memref<8x48xf32, #tpu.memory_space<vmem>>, %arg3: memref<16x1xf32, #tpu.memory_space<vmem>>, %arg4: memref<16x1xf32, #tpu.memory_space<vmem>>, %arg5: memref<8x1xf32, #tpu.memory_space<vmem>>, %arg6: memref<8x1xf32, #tpu.memory_space<vmem>>, %arg7: memref<1x128xf32, #tpu.memory_space<vmem>>, %arg8: memref<8x128xf32, #tpu.memory_space<vmem>>, %arg9: memref<16x130xf32, #tpu.memory_space<vmem>>) attributes {dimension_semantics = [], scalar_prefetch = 0 : i64, scratch_operands = 1 : i64, tpu.core_type = #tpu.core_type<tc>} {
    %c0 = arith.constant 0 : index
    %c0_0 = arith.constant 0 : index
    %0 = vector.load %arg7[%c0, %c0_0] : memref<1x128xf32, #tpu.memory_space<vmem>>, vector<1x128xf32>
    %c0_1 = arith.constant 0 : index
    %c0_2 = arith.constant 0 : index
    %1 = vector.load %arg0[%c0_1, %c0_2] : memref<8x130xf32, #tpu.memory_space<vmem>>, vector<8x128xf32>
    %c0_3 = arith.constant 0 : index
    %c1 = arith.constant 1 : index
    %2 = vector.load %arg0[%c0_3, %c1] : memref<8x130xf32, #tpu.memory_space<vmem>>, vector<8x128xf32>
    %c0_4 = arith.constant 0 : index
    %c2 = arith.constant 2 : index
    %3 = vector.load %arg0[%c0_4, %c2] : memref<8x130xf32, #tpu.memory_space<vmem>>, vector<8x128xf32>
    %4 = tpu.concatenate %1, %2, %3 in 0 : vector<8x128xf32>, vector<8x128xf32>, vector<8x128xf32> -> vector<24x128xf32>
    %c0_5 = arith.constant 0 : index
    %c0_6 = arith.constant 0 : index
    %5 = vector.load %arg1[%c0_5, %c0_6] : memref<16x24xf32, #tpu.memory_space<vmem>>, vector<16x24xf32>
    %cst = arith.constant dense<0.000000e+00> : vector<16x128xf32>
    %6 = tpu.matmul %5, %4, %cst {dimension_numbers = #tpu.dot_dimension_numbers<[1], [0], [0], [1], [0, 0, 1, 1], [], []>} : vector<16x24xf32>, vector<24x128xf32>, vector<16x128xf32> -> vector<16x128xf32>
    %7 = vector.broadcast %0 : vector<1x128xf32> to vector<16x128xf32>
    %8 = arith.mulf %6, %7 : vector<16x128xf32>
    %cst_7 = arith.constant dense<0.000000e+00> : vector<16xf32>
    %9 = vector.multi_reduction <add>, %8, %cst_7 [1] : vector<16x128xf32> to vector<16xf32>
    %10 = vector.shape_cast %9 : vector<16xf32> to vector<16x1xf32>
    %11 = arith.mulf %8, %8 : vector<16x128xf32>
    %cst_8 = arith.constant dense<0.000000e+00> : vector<16xf32>
    %12 = vector.multi_reduction <add>, %11, %cst_8 [1] : vector<16x128xf32> to vector<16xf32>
    %13 = vector.shape_cast %12 : vector<16xf32> to vector<16x1xf32>
    %cst_9 = arith.constant 3.125000e-02 : f32
    %14 = vector.broadcast %cst_9 : f32 to vector<16x1xf32>
    %15 = arith.mulf %10, %14 : vector<16x1xf32>
    %cst_10 = arith.constant 3.125000e-02 : f32
    %16 = vector.broadcast %cst_10 : f32 to vector<16x1xf32>
    %17 = arith.mulf %13, %16 : vector<16x1xf32>
    %18 = arith.mulf %15, %15 : vector<16x1xf32>
    %19 = arith.subf %17, %18 : vector<16x1xf32>
    %20 = vector.broadcast %15 : vector<16x1xf32> to vector<16x128xf32>
    %21 = arith.subf %8, %20 : vector<16x128xf32>
    %cst_11 = arith.constant 9.99999974E-6 : f32
    %22 = vector.broadcast %cst_11 : f32 to vector<16x1xf32>
    %23 = arith.addf %19, %22 : vector<16x1xf32>
    %24 = math.rsqrt %23 : vector<16x1xf32>
    %25 = vector.broadcast %24 : vector<16x1xf32> to vector<16x128xf32>
    %26 = arith.mulf %21, %25 : vector<16x128xf32>
    %c0_12 = arith.constant 0 : index
    %c0_13 = arith.constant 0 : index
    %27 = vector.load %arg3[%c0_12, %c0_13] : memref<16x1xf32, #tpu.memory_space<vmem>>, vector<16x1xf32>
    %28 = vector.broadcast %27 : vector<16x1xf32> to vector<16x128xf32>
    %29 = arith.mulf %26, %28 : vector<16x128xf32>
    %c0_14 = arith.constant 0 : index
    %c0_15 = arith.constant 0 : index
    %30 = vector.load %arg4[%c0_14, %c0_15] : memref<16x1xf32, #tpu.memory_space<vmem>>, vector<16x1xf32>
    %31 = vector.broadcast %30 : vector<16x1xf32> to vector<16x128xf32>
    %32 = arith.addf %29, %31 : vector<16x128xf32>
    %cst_16 = arith.constant 5.000000e-01 : f32
    %33 = vector.broadcast %cst_16 : f32 to vector<16x128xf32>
    %34 = arith.mulf %33, %32 : vector<16x128xf32>
    %cst_17 = arith.constant 0.707106769 : f32
    %35 = vector.broadcast %cst_17 : f32 to vector<16x128xf32>
    %36 = arith.mulf %32, %35 : vector<16x128xf32>
    %37 = math.erf %36 : vector<16x128xf32>
    %cst_18 = arith.constant 1.000000e+00 : f32
    %38 = vector.broadcast %cst_18 : f32 to vector<16x128xf32>
    %39 = arith.addf %38, %37 : vector<16x128xf32>
    %40 = arith.mulf %34, %39 : vector<16x128xf32>
    %41 = vector.broadcast %0 : vector<1x128xf32> to vector<16x128xf32>
    %42 = arith.mulf %40, %41 : vector<16x128xf32>
    %cst_19 = arith.constant 0.000000e+00 : f32
    %43 = vector.broadcast %cst_19 : f32 to vector<16x1xf32>
    %c0_20 = arith.constant 0 : index
    %c0_21 = arith.constant 0 : index
    %44 = vector.load %arg9[%c0_20, %c0_21] : memref<16x130xf32, #tpu.memory_space<vmem>>, vector<16x1xf32>
    tpu.vector_store %arg9[%c0_20, %c0_21], %43 {strides = array<i32>} : memref<16x130xf32, #tpu.memory_space<vmem>>, vector<16x1xf32>,
    %c0_22 = arith.constant 0 : index
    %c129 = arith.constant 129 : index
    %45 = vector.load %arg9[%c0_22, %c129] : memref<16x130xf32, #tpu.memory_space<vmem>>, vector<16x1xf32>
    tpu.vector_store %arg9[%c0_22, %c129], %43 {strides = array<i32>} : memref<16x130xf32, #tpu.memory_space<vmem>>, vector<16x1xf32>,
    %c0_23 = arith.constant 0 : index
    %c1_24 = arith.constant 1 : index
    %46 = vector.load %arg9[%c0_23, %c1_24] : memref<16x130xf32, #tpu.memory_space<vmem>>, vector<16x128xf32>
    tpu.vector_store %arg9[%c0_23, %c1_24], %42 {strides = array<i32>} : memref<16x130xf32, #tpu.memory_space<vmem>>, vector<16x128xf32>,
    %c0_25 = arith.constant 0 : index
    %c0_26 = arith.constant 0 : index
    %47 = vector.load %arg9[%c0_25, %c0_26] : memref<16x130xf32, #tpu.memory_space<vmem>>, vector<16x128xf32>
    %c0_27 = arith.constant 0 : index
    %c1_28 = arith.constant 1 : index
    %48 = vector.load %arg9[%c0_27, %c1_28] : memref<16x130xf32, #tpu.memory_space<vmem>>, vector<16x128xf32>
    %c0_29 = arith.constant 0 : index
    %c2_30 = arith.constant 2 : index
    %49 = vector.load %arg9[%c0_29, %c2_30] : memref<16x130xf32, #tpu.memory_space<vmem>>, vector<16x128xf32>
    %50 = tpu.concatenate %47, %48, %49 in 0 : vector<16x128xf32>, vector<16x128xf32>, vector<16x128xf32> -> vector<48x128xf32>
    %c0_31 = arith.constant 0 : index
    %c0_32 = arith.constant 0 : index
    %51 = vector.load %arg2[%c0_31, %c0_32] : memref<8x48xf32, #tpu.memory_space<vmem>>, vector<8x48xf32>
    %cst_33 = arith.constant dense<0.000000e+00> : vector<8x128xf32>
    %52 = tpu.matmul %51, %50, %cst_33 {dimension_numbers = #tpu.dot_dimension_numbers<[1], [0], [0], [1], [0, 0, 1, 1], [], []>} : vector<8x48xf32>, vector<48x128xf32>, vector<8x128xf32> -> vector<8x128xf32>
    %53 = vector.broadcast %0 : vector<1x128xf32> to vector<8x128xf32>
    %54 = arith.mulf %52, %53 : vector<8x128xf32>
    %cst_34 = arith.constant dense<0.000000e+00> : vector<8xf32>
    %55 = vector.multi_reduction <add>, %54, %cst_34 [1] : vector<8x128xf32> to vector<8xf32>
    %56 = vector.shape_cast %55 : vector<8xf32> to vector<8x1xf32>
    %57 = arith.mulf %54, %54 : vector<8x128xf32>
    %cst_35 = arith.constant dense<0.000000e+00> : vector<8xf32>
    %58 = vector.multi_reduction <add>, %57, %cst_35 [1] : vector<8x128xf32> to vector<8xf32>
    %59 = vector.shape_cast %58 : vector<8xf32> to vector<8x1xf32>
    %cst_36 = arith.constant 3.125000e-02 : f32
    %60 = vector.broadcast %cst_36 : f32 to vector<8x1xf32>
    %61 = arith.mulf %56, %60 : vector<8x1xf32>
    %cst_37 = arith.constant 3.125000e-02 : f32
    %62 = vector.broadcast %cst_37 : f32 to vector<8x1xf32>
    %63 = arith.mulf %59, %62 : vector<8x1xf32>
    %64 = arith.mulf %61, %61 : vector<8x1xf32>
    %65 = arith.subf %63, %64 : vector<8x1xf32>
    %66 = vector.broadcast %61 : vector<8x1xf32> to vector<8x128xf32>
    %67 = arith.subf %54, %66 : vector<8x128xf32>
    %cst_38 = arith.constant 9.99999974E-6 : f32
    %68 = vector.broadcast %cst_38 : f32 to vector<8x1xf32>
    %69 = arith.addf %65, %68 : vector<8x1xf32>
    %70 = math.rsqrt %69 : vector<8x1xf32>
    %71 = vector.broadcast %70 : vector<8x1xf32> to vector<8x128xf32>
    %72 = arith.mulf %67, %71 : vector<8x128xf32>
    %c0_39 = arith.constant 0 : index
    %c0_40 = arith.constant 0 : index
    %73 = vector.load %arg5[%c0_39, %c0_40] : memref<8x1xf32, #tpu.memory_space<vmem>>, vector<8x1xf32>
    %74 = vector.broadcast %73 : vector<8x1xf32> to vector<8x128xf32>
    %75 = arith.mulf %72, %74 : vector<8x128xf32>
    %c0_41 = arith.constant 0 : index
    %c0_42 = arith.constant 0 : index
    %76 = vector.load %arg6[%c0_41, %c0_42] : memref<8x1xf32, #tpu.memory_space<vmem>>, vector<8x1xf32>
    %77 = vector.broadcast %76 : vector<8x1xf32> to vector<8x128xf32>
    %78 = arith.addf %75, %77 : vector<8x128xf32>
    %c0_43 = arith.constant 0 : index
    %c0_44 = arith.constant 0 : index
    %79 = vector.load %arg8[%c0_43, %c0_44] : memref<8x128xf32, #tpu.memory_space<vmem>>, vector<8x128xf32>
    tpu.vector_store %arg8[%c0_43, %c0_44], %78 {strides = array<i32>} : memref<8x128xf32, #tpu.memory_space<vmem>>, vector<8x128xf32>,
    return
  }
}

</mosaic_0001>

<bundles_post_ra>
// kernel: tpu_custom_call.1
= control target key start
LH: loop header
LB: loop body
LE: loop exit
PB: predicated region body
PF: predicated region fallthrough
CT: control target
= control target key end

     0   :  { %s457_s29 = smov 127   ;;  %s458_s30 = smov 126   ;;  %vm51_vm0 = vcmask 195584   ;;  %v459_v3 = vmov 0   ;;  %s590_s0 = inlined_call_operand.vmem [shape: f32[8,130], index: 0, kind: input, shape index: {}]   ;;  %s591_s1 = inlined_call_operand.vmem [shape: f32[16,24], index: 1, kind: input, shape index: {}]   ;;  %s592_s2 = inlined_call_operand.vmem [shape: f32[8,48], index: 2, kind: input, shape index: {}]   ;;  %s593_s3 = inlined_call_operand.vmem [shape: f32[16,1], index: 3, kind: input, shape index: {}]   ;;  %s594_s4 = inlined_call_operand.vmem [shape: f32[16,1], index: 4, kind: input, shape index: {}]   ;;  %s595_s5 = inlined_call_operand.vmem [shape: f32[8,1], index: 5, kind: input, shape index: {}]   ;;  %s596_s6 = inlined_call_operand.vmem [shape: f32[8,1], index: 6, kind: input, shape index: {}]   ;;  %s597_s7 = inlined_call_operand.vmem [shape: f32[1,128], index: 7, kind: input, shape index: {}]   ;;  %s598_s8 = inlined_call_operand.hbm [shape: f32[8,128], index: 8, kind: output, shape index: {}]  }
   0x1   :  { %v31_v0 = vld [vmem:[%s590_s0] sm:$0xff]  ;;  %v32_v2 = vld [vmem:[%s590_s0 + $0x8] sm:$0xff]  ;;  %423 = vset.pattern.permute.xlu1 %v459_v3 }
   0x2   :  { %35 = vrot.lane.b32.xlu1 %v31_v0, %s457_s29  ;;  %42 = vrot.lane.b32.xlu0 %v31_v0, %s458_s30  ;;  %v49_v1 = vld [vmem:[%s591_s1] sm:$0xff] }
   0x3   :  { %398 = vmatprep.mubr.msk.f32.mxu0 %vm51_vm0, %v49_v1 }
   0x4   :  { %13 = vsyncpa [#allocation4], 0  ;;  %424 = vset.pattern.permute.xlu0 %v459_v3  ;;  %v168_v4 = vld [vmem:[%s593_s3 + $0x8] sm:$0xff]  ;;  %vm46_vm1 = vcmask 1031168   ;;  %vm39_vm2 = vcmask 1039360   ;;  %v181_v20 = vld [vmem:[%s594_s4] sm:$0xff] }
   0x5   :  { %v50_v11 = vld [vmem:[%s591_s1 + $0x8] sm:$0xff]  ;;  %v535_v12 = vld [vmem:[%s597_s7] ss:$0 sm:$0xff]  ;;  %vm207_vm3 = vcmask 7168   ;;  %vm210_vm4 = vcmask 15368   ;;  %v460_v22 = vmov 0.0  }
   0x6   :  { %37 = vrot.lane.b32.xlu1 %v32_v2, %s457_s29  ;;  %44 = vrot.lane.b32.xlu0 %v32_v2, %s458_s30  ;;  %v182_v19 = vld [vmem:[%s594_s4 + $0x8] sm:$0xff]  ;;  %v167_v21 = vld [vmem:[%s593_s3] sm:$0xff]  ;;  %209 = vst.msk [vmem:[#allocation2 + $0x10] sm:$0xff] %vm207_vm3, %v460_v22  ;;  %208 = vst.msk [vmem:[#allocation2] sm:$0xff] %vm207_vm3, %v460_v22  ;;  %s461_s3 = smov 1   ;;  %vm221_vm5 = vcmask 1047560  }
   0x7   :  { %212 = vst.msk [vmem:[#allocation2 + $0x18] sm:$0xff] %vm210_vm4, %v460_v22  ;;  %211 = vst.msk [vmem:[#allocation2 + $0x8] sm:$0xff] %vm210_vm4, %v460_v22  ;;  %401 = vmatprep.subr.mxu1 %v460_v22  ;;  %vm462_vm6 = vmmov 0   ;;  %vm259_vm7 = vcmask 392192  }
   0x8   :  { %413 = vmatprep.mubr.msk.f32.mxu1 %vm462_vm6, %v460_v22 }
   0xa   :  { %176 = vperm.xlu1 %423, %v168_v4  }
  0x74   :  { %v36_v5 = vpop.permute.xlu1 %35  ;;  %v43_v6 = vpop.permute.xlu0 %42 }
  0x78   :  { %v38_v7 = vpop.permute.xlu1 %37  ;;  %v45_v8 = vpop.permute.xlu0 %44 }
  0x79   :  { %v47_v9 = vsel %vm46_vm1, %v43_v6, %v45_v8  ;;  %v40_v10 = vsel %vm39_vm2, %v36_v5, %v38_v7 }
  0x7a   :  { %392 = vmatprep.subr.mxu0 %v47_v9 }
  0x7b   :  { %393 = vmatpush3.msra.mxu0 %v47_v9 }
  0x7c   :  { %394 = vmatprep.subr.mxu0 %v40_v10 }
  0x7d   :  { %395 = vmatpush3.msra.mxu0 %v40_v10 }
  0x7e   :  { %396 = vmatprep.subr.mxu0 %v31_v0 }
  0x7f   :  { %397 = vmatpush3.msra.mxu0 %v31_v0 }
  0x80   :  { %399 = vmatmul.mubr.msk.f32.vlgmr.msra.gmra.mxu0 %vm51_vm0, %v50_v11 }
  0x85   :  { %v177_v23 = vpop.permute.xlu1 %176 }
 0x140   :  { %v400_v13 = vpop.f32.mrf.mxu0 }
 0x141   :  { %v140_v14 = vmul.f32 %v400_v13, %v535_v12 }
 0x142   :  { %v124_v15 = vpop.f32.mrf.mxu0 }
 0x143   :  { %v139_v16 = vmul.f32 %v535_v12, %v124_v15  ;;  %143 = vadd.xlane.f32.xlu0 %v140_v14  ;;  %v146_v17 = vmul.f32 %v140_v14, %v140_v14 }
 0x145   :  { %141 = vadd.xlane.f32.xlu1 %v139_v16  ;;  %v145_v18 = vmul.f32 %v139_v16, %v139_v16 }
 0x147   :  { %149 = vadd.xlane.f32.xlu0 %v146_v17 }
 0x14b   :  { %147 = vadd.xlane.f32.xlu0 %v145_v18  ;;  %v258_v18 = vld [vmem:[%s592_s2] sm:$0xff]  ;;  %s463_s2 = smov [#allocation3]  }
 0x156   :  { %190 = vperm.xlu1 %423, %v182_v19  }
 0x15a   :  { %185 = vperm.xlu1 %423, %v181_v20  }
 0x161   :  { %171 = vperm.xlu0 %424, %v167_v21  }
 0x1cc   :  { %v144_v24 = vpop.xlane.xlu0 %143 }
 0x1cd   :  { %v152_v25 = vmul.f32 0.03125, %v144_v24  ;;  %v354_v24 = vld [vmem:[%s596_s6] sm:$0xff]  ;;  %s368_s6 = sshll.u32 %s463_s2, 4  ;;  %s369_s6 = int_to_ptr.vmem [resolvable:$true] %s368_s6 }
 0x1ce   :  { %v142_v26 = vpop.xlane.xlu1 %141  ;;  %p440_p1 = scmp.lt.s32.totalorder %s369_s6, %s369_s6 }
 0x1cf   :  { %v156_v28 = vmul.f32 %v152_v25, %v152_v25  ;;  %v151_v29 = vmul.f32 0.03125, %v142_v26  ;;  %v160_v38 = vsub.f32 %v140_v14, %v152_v25  ;;  %v347_v25 = vld [vmem:[%s595_s5] sm:$0xff]  ;;  %s435_s5 = scalar_lea.vmem %s369_s6, 128 }
 0x1d0   :  { %v150_v27 = vpop.xlane.xlu0 %149  ;;  %p436_p0 = scmp.ne.s32.totalorder %s369_s6, %s435_s5  ;;  %p441_p2 = scmp.lt.s32.totalorder %s435_s5, %s435_s5 }
 0x1d1   :  { %v154_v30 = vmul.f32 0.03125, %v150_v27  ;;  %v155_v33 = vmul.f32 %v151_v29, %v151_v29  ;;  %v159_v42 = vsub.f32 %v139_v16, %v151_v29 }
 0x1d2   :  { %v191_v41 = vpop.permute.xlu1 %190  ;;  %p442_p3 = por %p441_p2, %p440_p1 }
 0x1d3   :  { %v158_v31 = vsub.f32 %v154_v30, %v156_v28 }
 0x1d4   :  { %v148_v32 = vpop.xlane.xlu0 %147  ;;  %p443_p4 = pnand %p442_p3, %p436_p0 }
 0x1d5   :  { %v162_v34 = vadd.f32 1e-05, %v158_v31  ;;  %v153_v35 = vmul.f32 0.03125, %v148_v32 }
 0x1d6   :  { %v186_v50 = vpop.permute.xlu1 %185 }
 0x1d7   :  { %425 = vrsqrt.f32 %v162_v34  ;;  %v157_v36 = vsub.f32 %v153_v35, %v155_v33 }
 0x1d9   :  { %v161_v37 = vadd.f32 1e-05, %v157_v36 }
 0x1db   :  { %427 = vrsqrt.f32 %v161_v37 }
 0x1dc   :  { %v172_v45 = vpop.permute.xlu0 %171 }
 0x1e4   :  { %v426_v39 = vpop.eup %425 }
 0x1e5   :  { %v166_v40 = vmul.f32 %v426_v39, %v160_v38 }
 0x1e7   :  { %v180_v43 = vmul.f32 %v177_v23, %v166_v40 }
 0x1e8   :  { %v428_v44 = vpop.eup %427 }
 0x1e9   :  { %v194_v46 = vadd.f32 %v191_v41, %v180_v43  ;;  %v165_v47 = vmul.f32 %v428_v44, %v159_v42 }
 0x1eb   :  { %v198_v48 = vmul.f32 0.70710677, %v194_v46  ;;  %v179_v49 = vmul.f32 %v172_v45, %v165_v47  ;;  %v196_v54 = vmul.f32 0.5, %v194_v46 }
 0x1ed   :  { %429 = verf.f32 %v198_v48  ;;  %v193_v51 = vadd.f32 %v186_v50, %v179_v49 }
 0x1ef   :  { %v197_v52 = vmul.f32 0.70710677, %v193_v51  ;;  %v195_v58 = vmul.f32 0.5, %v193_v51 }
 0x1f1   :  { %431 = verf.f32 %v197_v52 }
 0x1fa   :  { %v430_v53 = vpop.eup %429 }
 0x1fb   :  { %v202_v55 = vadd.f32 1.0, %v430_v53 }
 0x1fd   :  { %v204_v56 = vmul.f32 %v202_v55, %v196_v54 }
 0x1fe   :  { %v432_v57 = vpop.eup %431 }
 0x1ff   :  { %v206_v59 = vmul.f32 %v535_v12, %v204_v56  ;;  %v201_v60 = vadd.f32 1.0, %v432_v57 }
 0x201   :  { %217 = vrot.lane.b32.xlu1 %v206_v59, %s461_s3  ;;  %v203_v61 = vmul.f32 %v201_v60, %v195_v58 }
 0x203   :  { %v205_v62 = vmul.f32 %v535_v12, %v203_v61 }
 0x205   :  { %215 = vrot.lane.b32.xlu1 %v205_v62, %s461_s3 }
 0x273   :  { %v218_v63 = vpop.permute.xlu1 %217 }
 0x274   :  { %224 = vst.msk [vmem:[#allocation2 + $0x10] sm:$0xff] %vm221_vm5, %v218_v63 }
 0x275   :  { %225 = vst.msk [vmem:[#allocation2 + $0x18] sm:$0xff] %vm207_vm3, %v218_v63 }
 0x277   :  { %v216_v0 = vpop.permute.xlu1 %215 }
 0x278   :  { %222 = vst.msk [vmem:[#allocation2] sm:$0xff] %vm221_vm5, %v216_v0 }
 0x279   :  { %223 = vst.msk [vmem:[#allocation2 + $0x8] sm:$0xff] %vm207_vm3, %v216_v0 }
 0x27b   :  { %v227_v1 = vld [vmem:[#allocation2 + $0x10] sm:$0xff] }
 0x27c   :  { %238 = vrot.lane.b32.xlu0 %v227_v1, %s457_s29  ;;  %250 = vrot.lane.b32.xlu1 %v227_v1, %s458_s30  ;;  %v229_v2 = vld [vmem:[#allocation2 + $0x18] sm:$0xff] }
 0x27f   :  { %v226_v3 = vld [vmem:[#allocation2] sm:$0xff] }
 0x280   :  { %252 = vrot.lane.b32.xlu1 %v229_v2, %s458_s30  ;;  %234 = vrot.lane.b32.xlu0 %v226_v3, %s457_s29  ;;  %v228_v4 = vld [vmem:[#allocation2 + $0x8] sm:$0xff] }
 0x284   :  { %240 = vrot.lane.b32.xlu1 %v229_v2, %s457_s29 }
 0x288   :  { %246 = vrot.lane.b32.xlu1 %v226_v3, %s458_s30 }
 0x28c   :  { %248 = vrot.lane.b32.xlu1 %v228_v4, %s458_s30 }
 0x290   :  { %236 = vrot.lane.b32.xlu1 %v228_v4, %s457_s29 }
 0x2ee   :  { %v251_v5 = vpop.permute.xlu1 %250  ;;  %v239_v10 = vpop.permute.xlu0 %238 }
 0x2f2   :  { %v253_v6 = vpop.permute.xlu1 %252  ;;  %v235_v15 = vpop.permute.xlu0 %234 }
 0x2f3   :  { %v255_v7 = vsel %vm46_vm1, %v251_v5, %v253_v6 }
 0x2f4   :  { %402 = vmatpush3.msra.mxu1 %v255_v7 }
 0x2f5   :  { %403 = vmatprep.subr.mxu1 %v460_v22 }
 0x2f6   :  { %v241_v8 = vpop.permute.xlu1 %240 }
 0x2f7   :  { %v243_v14 = vsel %vm39_vm2, %v239_v10, %v241_v8 }
 0x2fa   :  { %v247_v9 = vpop.permute.xlu1 %246 }
 0x2fe   :  { %v249_v11 = vpop.permute.xlu1 %248 }
 0x2ff   :  { %v254_v13 = vsel %vm46_vm1, %v247_v9, %v249_v11 }
 0x300   :  { %404 = vmatpush3.msra.mxu1 %v254_v13 }
 0x301   :  { %405 = vmatprep.subr.mxu1 %v460_v22 }
 0x302   :  { %v237_v16 = vpop.permute.xlu1 %236  ;;  %406 = vmatpush3.msra.mxu1 %v243_v14 }
 0x303   :  { %407 = vmatprep.subr.mxu1 %v460_v22  ;;  %v242_v17 = vsel %vm39_vm2, %v235_v15, %v237_v16 }
 0x304   :  { %408 = vmatpush3.msra.mxu1 %v242_v17 }
 0x305   :  { %409 = vmatprep.subr.mxu1 %v460_v22 }
 0x306   :  { %410 = vmatpush3.msra.mxu1 %v227_v1 }
 0x307   :  { %411 = vmatprep.subr.mxu1 %v460_v22 }
 0x308   :  { %412 = vmatpush3.msra.mxu1 %v226_v3 }
 0x309   :  { %414 = vmatmul.mubr.msk.f32.vlgmr.msra.gmra.mxu1 %vm259_vm7, %v258_v18 }
 0x3c9   :  { %v329_v19 = vpop.f32.mrf.mxu1 }
 0x3ca   :  { %v333_v20 = vmul.f32 %v535_v12, %v329_v19 }
 0x3cb   :  { %v415_v21 = vpop.f32.mrf.mxu1 }
 0x3cc   :  { %334 = vadd.xlane.f32.xlu0 %v333_v20  ;;  %v336_v23 = vmul.f32 %v333_v20, %v333_v20 }
 0x3ce   :  { %337 = vadd.xlane.f32.xlu1 %v336_v23 }
 0x3df   :  { %357 = vperm.xlu1 %423, %v354_v24  }
 0x3e2   :  { %350 = vperm.xlu0 %424, %v347_v25  }
 0x455   :  { %v335_v22 = vpop.xlane.xlu0 %334 }
 0x456   :  { %v339_v26 = vmul.f32 0.03125, %v335_v22 }
 0x457   :  { %v338_v27 = vpop.xlane.xlu1 %337 }
 0x458   :  { %v341_v28 = vmul.f32 %v339_v26, %v339_v26  ;;  %v340_v29 = vmul.f32 0.03125, %v338_v27  ;;  %v343_v31 = vsub.f32 %v333_v20, %v339_v26 }
 0x45a   :  { %v342_v12 = vsub.f32 %v340_v29, %v341_v28 }
 0x45b   :  { %v358_v36 = vpop.permute.xlu1 %357 }
 0x45c   :  { %v344_v30 = vadd.f32 1e-05, %v342_v12 }
 0x45d   :  { %v351_v34 = vpop.permute.xlu0 %350 }
 0x45e   :  { %433 = vrsqrt.f32 %v344_v30 }
 0x46b   :  { %v434_v32 = vpop.eup %433 }
 0x46c   :  { %v346_v33 = vmul.f32 %v434_v32, %v343_v31 }
 0x46e   :  { %v353_v35 = vmul.f32 %v351_v34, %v346_v33 }
 0x470   :  { %v360_v37 = vadd.f32 %v358_v36, %v353_v35 }
 0x472   :  { %361 = vst [vmem:[#allocation3] sm:$0xff] %v360_v37 }
 0x473   :  { %446 = shalt.err (!%p443_p4)
}
 0x474   :  { %371 = dma.vmem_to_hbm [thread:$0]  %s369_s6, 128, %s598_s8, [#allocation4]  }
 0x475   :  { %455 = dma.done.wait [#allocation4], 128  }
 0x476   :  { %456 = vsyncadd [#allocation4], 4294967168 }
 0x477   :  { %375 = vsyncpa [#allocation4], 1 }

</bundles_post_ra>
